<compile_context>
chip_gen: v7x
topology: tpu7x:2x2x1
jax: 0.10.0
libtpu: 0.0.40
codegen_flags: <defaults>
</compile_context>

<pallas_src>
import functools

import jax
import jax.numpy as jnp
from jax.experimental import pallas as pl
from jax.experimental.pallas import tpu as pltpu


def _encoder_kernel(w_ref, f_ref, o_ref):
    # w_ref: (N, L)  resident filterbank
    # f_ref: (L, tk) frame taps on sublanes, frame index on lanes
    # o_ref: (N, tk) lane-dense output tile, already in [B, N, K] orientation
    acc = jnp.dot(w_ref[...], f_ref[...], preferred_element_type=jnp.float32)
    o_ref[...] = jnp.maximum(acc, 0.0).astype(o_ref.dtype)


@functools.partial(jax.jit, static_argnames=("L", "N", "tk_max"))
def encoder_forward(mixture, conv_weight, *, L, N, tk_max=2048):
    """mixture: [B, T] float32, conv_weight: [N, 1, L] (PyTorch Conv1d layout).

    Returns mixture_w: [B, N, K] with K = (T - L) // (L // 2) + 1.
    """
    B, T = mixture.shape
    stride = L // 2
    K = (T - L) // stride + 1

    # --- lane-tile selection ------------------------------------------------
    # Either a single full-K block (legal for any K: block dim == array dim),
    # or a big multiple-of-128 tile so output stores stay unmasked/lane-dense.
    if K <= tk_max:
        tk = K
    else:
        tk = max(128, (tk_max // 128) * 128)
    grid_k = pl.cdiv(K, tk)
    K_pad = grid_k * tk

    # --- glue: gather frames directly in transposed [B, L, K_pad] layout ----
    # frames_T[b, l, k] = mixture[b, k*stride + l]; indices for k >= K are
    # clamped (finite garbage) and the corresponding output columns are
    # clipped by Pallas on write-back (output array is exactly [B, N, K]).
    k_idx = jnp.arange(K_pad, dtype=jnp.int32) * stride          # [K_pad]
    l_idx = jnp.arange(L, dtype=jnp.int32)                       # [L]
    idx = jnp.minimum(l_idx[:, None] + k_idx[None, :], T - 1)    # [L, K_pad]
    frames_T = mixture[:, idx]                                   # [B, L, K_pad]

    w = conv_weight[:, 0, :].astype(jnp.float32)                 # [N, L]

    out = pl.pallas_call(
        _encoder_kernel,
        out_shape=jax.ShapeDtypeStruct((B, N, K), jnp.float32),
        grid=(B, grid_k),
        in_specs=[
            # small filterbank, constant block index -> fetched once, resident
            pl.BlockSpec((N, L), lambda b, j: (0, 0)),
            # one (L, tk) frame tile per (batch, k-tile); batch dim squeezed
            pl.BlockSpec((None, L, tk), lambda b, j: (b, 0, j)),
        ],
        out_specs=pl.BlockSpec((None, N, tk), lambda b, j: (b, 0, j)),
        compiler_params=pltpu.CompilerParams(
            dimension_semantics=("parallel", "parallel")),
    )(w, frames_T)

    return out                                                   # [B, N, K]


def _reference_forward(mixture, conv_weight, L):
    """Pure-JAX reference (same math as PyTorch F.relu(conv1d(x)))."""
    stride = L // 2
    x = mixture[:, None, :]                                      # [B, 1, T]
    y = jax.lax.conv_general_dilated(
        x, conv_weight, window_strides=(stride,), padding="VALID",
        dimension_numbers=("NCH", "OIH", "NCH"))
    return jnp.maximum(y, 0.0)


if __name__ == "__main__":
    key = jax.random.PRNGKey(0)
    k_x, k_w, k_x2 = jax.random.split(key, 3)

    # Small shapes consistent with the module.
    L, N = 16, 32            # kernel size / num filters
    B, T = 2, 136            # -> K = (136 - 16) // 8 + 1 = 16

    mixture = jax.random.normal(k_x, (B, T), dtype=jnp.float32)
    # Deterministic synthetic weights (shape matches nn.Conv1d(1, N, L).weight).
    conv_weight = (jax.random.normal(k_w, (N, 1, L), dtype=jnp.float32)
                   * (1.0 / jnp.sqrt(L)))

    out = jax.block_until_ready(encoder_forward(mixture, conv_weight, L=L, N=N))
    ref = _reference_forward(mixture, conv_weight, L)
    K = (T - L) // (L // 2) + 1
    assert out.shape == ref.shape == (B, N, K), out.shape
    assert jnp.allclose(out, ref, atol=1e-5, rtol=1e-5), "mismatch vs reference"

    # Second case: multi-tile K with a partial (clipped) boundary tile,
    # exercising the lane-dense tiling path on >1 grid step per batch.
    T2 = 2192                # -> K = 273; tk_max=128 -> 3 k-tiles, last partial
    mixture2 = jax.random.normal(k_x2, (B, T2), dtype=jnp.float32)
    out2 = jax.block_until_ready(
        encoder_forward(mixture2, conv_weight, L=L, N=N, tk_max=128))
    ref2 = _reference_forward(mixture2, conv_weight, L)
    assert out2.shape == ref2.shape, (out2.shape, ref2.shape)
    assert jnp.allclose(out2, ref2, atol=1e-5, rtol=1e-5), "mismatch (tiled K)"

    print("KERNEL_OK")
</pallas_src>

<mosaic_0001>
module attributes {stable_mosaic.version = 11 : i64} {
  func.func @_encoder_kernel(%arg0: i32, %arg1: i32, %arg2: memref<32x16xf32, #tpu.memory_space<vmem>>, %arg3: memref<1x16x16xf32, #tpu.memory_space<vmem>>, %arg4: memref<1x32x16xf32, #tpu.memory_space<vmem>>) attributes {dimension_semantics = [#tpu.dimension_semantics<parallel>, #tpu.dimension_semantics<parallel>], iteration_bounds = array<i64: 2, 1>, scalar_prefetch = 0 : i64, scratch_operands = 0 : i64, tpu.core_type = #tpu.core_type<tc>, window_params = [{pipeline_mode = #tpu.pipeline_mode<synchronous>, transform_indices = @transform_0, window_bounds = array<i64: 32, 16>}, {transform_indices = @transform_1, window_bounds = array<i64: 1, 16, 16>}, {transform_indices = @transform_2, window_bounds = array<i64: 1, 32, 16>}]} {
    %c0 = arith.constant 0 : index
    %c0_0 = arith.constant 0 : index
    %0 = vector.load %arg2[%c0, %c0_0] : memref<32x16xf32, #tpu.memory_space<vmem>>, vector<32x16xf32>
    %c0_1 = arith.constant 0 : index
    %c0_2 = arith.constant 0 : index
    %c0_3 = arith.constant 0 : index
    %1 = vector.load %arg3[%c0_1, %c0_2, %c0_3] : memref<1x16x16xf32, #tpu.memory_space<vmem>>, vector<1x16x16xf32>
    %2 = vector.shape_cast %1 : vector<1x16x16xf32> to vector<16x16xf32>
    %cst = arith.constant dense<0.000000e+00> : vector<32x16xf32>
    %3 = tpu.matmul %0, %2, %cst {dimension_numbers = #tpu.dot_dimension_numbers<[1], [0], [0], [1], [0, 0, 1, 1], [], []>} : vector<32x16xf32>, vector<16x16xf32>, vector<32x16xf32> -> vector<32x16xf32>
    %cst_4 = arith.constant 0.000000e+00 : f32
    %4 = vector.broadcast %cst_4 : f32 to vector<32x16xf32>
    %5 = arith.maximumf %3, %4 : vector<32x16xf32>
    %c0_5 = arith.constant 0 : index
    %c0_6 = arith.constant 0 : index
    %c0_7 = arith.constant 0 : index
    %6 = vector.load %arg4[%c0_5, %c0_6, %c0_7] : memref<1x32x16xf32, #tpu.memory_space<vmem>>, vector<1x32x16xf32>
    %7 = vector.shape_cast %6 : vector<1x32x16xf32> to vector<32x16xf32>
    %8 = vector.shape_cast %5 : vector<32x16xf32> to vector<1x32x16xf32>
    tpu.vector_store %arg4[%c0_5, %c0_6, %c0_7], %8 {strides = array<i32>} : memref<1x32x16xf32, #tpu.memory_space<vmem>>, vector<1x32x16xf32>,
    return
  }
  func.func @transform_0(%arg0: i32, %arg1: i32) -> (i32, i32) {
    %c0_i32 = arith.constant 0 : i32
    %c0_i32_0 = arith.constant 0 : i32
    %c0_i32_1 = arith.constant 0 : i32
    return %c0_i32, %c0_i32_0 : i32, i32
  }
  func.func @transform_1(%arg0: i32, %arg1: i32) -> (i32, i32, i32) {
    %c0_i32 = arith.constant 0 : i32
    %c0_i32_0 = arith.constant 0 : i32
    return %arg0, %c0_i32, %arg1 : i32, i32, i32
  }
  func.func @transform_2(%arg0: i32, %arg1: i32) -> (i32, i32, i32) {
    %c0_i32 = arith.constant 0 : i32
    %c0_i32_0 = arith.constant 0 : i32
    return %arg0, %c0_i32, %arg1 : i32, i32, i32
  }
}

</mosaic_0001>

<bundles_post_ra>
// kernel: encoder_forward.1
= control target key start
LH: loop header
LB: loop body
LE: loop exit
PB: predicated region body
PF: predicated region fallthrough
CT: control target
= control target key end

     0   :  { %s472_s9 = smov 0   ;;  %s474_s10 = smov 0   ;;  %s525_s0 = inlined_call_operand.vmem [shape: f32[32,16], index: 0, kind: input, shape index: {}]   ;;  %s526_s1 = inlined_call_operand.vmem [shape: f32[2,16,16], index: 1, kind: input, shape index: {}]   ;;  %s527_s2 = inlined_call_operand.vmem [shape: f32[2,32,16], index: 2, kind: output, shape index: {}]  }
   0x1   :  { %s476_s11 = smov 0  }
   0x2 LB: > { %s24_s12 = sadd.s32 1, %s451_s10  ;;  %p374_p0 = scmp.ge.s32.totalorder %s455_s11, 1  ;;  %s455_s11 = sphi %s476_s11, %s12_s11   ;;  %s451_s10 = sphi %s474_s10, %s529_s10   ;;  %s447_s9 = sphi %s472_s9, %s528_s9  }
   0x3   : > { %p26_p1 = scmp.ge.s32.totalorder %s24_s12, 2  ;;  %p131_p2 = scmp.lt.s32.totalorder %s455_s11, 3 }
   0x5   : > { %s531_s12 = smov (%p26_p1, %s24_s12), 0  ;;  %p132_p3 = pnand %p374_p0, %p131_p2 }
   0x6   : > { %p159_p4 = scmp.lt.s32.totalorder (!%p132_p3), %s447_s9, 1  ;;  %v175_v0 = vld [vmem:[%s525_s0] sm:$0xff] (!%p132_p3)  ;;  %vm181_vm0 = vcmask (!%p132_p3), 130048   ;;  %v177_v1 = vld [vmem:[%s525_s0 + $0x10] sm:$0xff] (!%p132_p3)  ;;  %v176_v5 = vld [vmem:[%s525_s0 + $0x8] sm:$0xff] (!%p132_p3) }
   0x7   : > { %135 = sbr.rel (%p132_p3) target bundleno = 240 (0xf0), region = 28  ;;  %397 = vmatprep.mubr.msk.f32.mxu0 (!%p132_p3), %vm181_vm0, %v175_v0  ;;  %400 = vmatprep.mubr.msk.f32.mxu1 (!%p132_p3), %vm181_vm0, %v177_v1  ;;  %v178_v6 = vld [vmem:[%s525_s0 + $0x18] sm:$0xff] (!%p132_p3) }
   0xe   : > { %s533_s9 = smov (!%p159_p4, %s447_s9), 1 }
   0xf   : > { %s385_s17 = sshll.u32 %s533_s9, 4  ;;  %s386_s25 = sshll.u32 %s533_s9, 5 }
  0x10   : > { %s166_s20 = scalar_lea.vmem %s526_s1, %s385_s17  ;;  %s174_s28 = scalar_lea.vmem %s527_s2, %s386_s25 }
  0x11   : > { %v179_v2 = vld [vmem:[%s166_s20] sm:$0xff]  ;;  %v180_v3 = vld [vmem:[%s166_s20 + $0x8] sm:$0xff] }
  0x12   : > { %v403_v4 = vpack.c.bf16 %v180_v3, %v179_v2 }
  0x14   : > { %404 = vmatprep.subr.bf16.mxu0 %v403_v4  ;;  %407 = vmatprep.subr.bf16.mxu1 %v403_v4 }
  0x15   : > { %406 = vmatpush3.bf16.msra.mxu0 %v403_v4  ;;  %408 = vmatpush3.bf16.msra.mxu1 %v403_v4 }
  0x18   : > { %398 = vmatmul.mubr.msk.f32.vlgmr.msra.gmra.mrb[0].mxu0 %vm181_vm0, %v176_v5  ;;  %401 = vmatmul.mubr.msk.f32.vlgmr.msra.gmra.mrb[0].mxu1 %vm181_vm0, %v178_v6 }
  0xeb   : > { %v399_v7 = vpop.f32.mrb[0].mxu0  ;;  %v402_v8 = vpop.f32.mrb[0].mxu1 }
  0xec   : > { %v280_v9 = vmax.f32 %v399_v7, 0.0  ;;  %v282_v10 = vmax.f32 %v402_v8, 0.0  ;;  %v260_v11 = vpop.f32.mrb[1].mxu0  ;;  %v270_v12 = vpop.f32.mrb[1].mxu1 }
  0xed   : > { %v279_v13 = vmax.f32 %v260_v11, 0.0  ;;  %v281_v14 = vmax.f32 %v270_v12, 0.0 }
  0xee   : > { %284 = vst.msk [vmem:[%s174_s28 + $0x8] sm:$0xff] %vm181_vm0, %v280_v9  ;;  %286 = vst.msk [vmem:[%s174_s28 + $0x18] sm:$0xff] %vm181_vm0, %v282_v10 }
  0xef   : > { %283 = vst.msk [vmem:[%s174_s28] sm:$0xff] %vm181_vm0, %v279_v13  ;;  %285 = vst.msk [vmem:[%s174_s28 + $0x10] sm:$0xff] %vm181_vm0, %v281_v14 }
  0xf0 PF: > { %s12_s11 = sadd.s32 1, %s455_s11   ;;  %s528_s9 = smov %s451_s10 }
  0xf1   : > { %p9_p5 = scmp.ge.s32.totalorder %s12_s11, 4   ;;  %s529_s10 = smov %s531_s12 }
  0xf3   :  { %11 = sbr.rel (!%p9_p5) target bundleno = 2 (0x2), region = 58 }

</bundles_post_ra>
